<compile_context>
chip_gen: v6e
topology: v6e:2x2x1
jax: 0.10.0
libtpu: 0.0.40
codegen_flags: <defaults>
</compile_context>

<pallas_src>
import functools

import jax
import jax.numpy as jnp
from jax.experimental import pallas as pl
from jax.experimental.pallas import tpu as pltpu


def _mlp_fused_kernel(x_ref, *refs, num_layers, sigmoid_output):
    """Fused MLP:  y = act(...act(x @ W0 + b0)... @ W_{L-1} + b_{L-1})."""
    o_ref = refs[-1]
    params = refs[:-1]                      # (w0, b0, w1, b1, ...)
    y = x_ref[...]                          # (M, K0)
    for i in range(num_layers):
        w = params[2 * i][...]              # (K_i, N_i)  pre-transposed -> MXU-native
        b = params[2 * i + 1][...]          # (1, N_i)
        y = jnp.dot(y, w, preferred_element_type=jnp.float32) + b
        if i < num_layers - 1:
            y = jnp.maximum(y, 0.0)         # ReLU on the VPU
    if sigmoid_output:
        # exp on the EUP + full-precision reciprocal; stays within 1e-5 of
        # jax.nn.sigmoid.
        y = pl.reciprocal(1.0 + jnp.exp(-y), approx=False)
    o_ref[...] = y.astype(o_ref.dtype)


def mlp_forward_pallas(x2d, weights_t, biases, sigmoid_output, *, tm=512):
    """x2d: (M, K) f32. weights_t[i]: (K_i, N_i) pre-transposed. biases[i]: (N_i,)."""
    M, K = x2d.shape
    num_layers = len(weights_t)
    n_out = weights_t[-1].shape[1]

    flat_params = []
    for w, b in zip(weights_t, biases):
        flat_params.append(w)
        flat_params.append(b.reshape(1, -1))

    kernel = functools.partial(
        _mlp_fused_kernel, num_layers=num_layers, sigmoid_output=sigmoid_output
    )

    if M <= tm:
        # Small-M path: everything fits in VMEM as whole-array blocks; no grid,
        # no per-step pipeline scaffolding, single output store.
        return pl.pallas_call(
            kernel,
            out_shape=jax.ShapeDtypeStruct((M, n_out), x2d.dtype),
            in_specs=[pl.BlockSpec(memory_space=pltpu.MemorySpace.VMEM)]
            * (1 + len(flat_params)),
            out_specs=pl.BlockSpec(memory_space=pltpu.MemorySpace.VMEM),
        )(x2d, *flat_params)

    # Large-M path: tile only the M axis; weights/biases stay VMEM-resident
    # across the whole grid (index_map returns (0, 0)).  512-row f32 tiles sit
    # near the HBM roofline; "parallel" lets v7x shard M across its 2 TCs.
    m_pad = tm * pl.cdiv(M, tm)
    xp = x2d if m_pad == M else jnp.pad(x2d, ((0, m_pad - M), (0, 0)))

    param_specs = []
    for w, b in zip(weights_t, biases):
        param_specs.append(pl.BlockSpec(w.shape, lambda i: (0, 0)))
        param_specs.append(pl.BlockSpec((1, int(b.shape[0])), lambda i: (0, 0)))

    out = pl.pallas_call(
        kernel,
        out_shape=jax.ShapeDtypeStruct((m_pad, n_out), x2d.dtype),
        grid=(m_pad // tm,),
        in_specs=[pl.BlockSpec((tm, K), lambda i: (i, 0))] + param_specs,
        out_specs=pl.BlockSpec((tm, n_out), lambda i: (i, 0)),
        compiler_params=pltpu.CompilerParams(
            dimension_semantics=("parallel",),
            # Sized conservatively against v7x's smaller (64 MiB) VMEM.
            vmem_limit_bytes=48 * 1024 * 1024,
        ),
    )(xp, *flat_params)
    return out[:M]


class MLPPallas:
    """JAX/Pallas equivalent of the PyTorch MLP module."""

    def __init__(self, input_dim, hidden_dim, output_dim, num_layers,
                 sigmoid_output=False, key=None):
        self.num_layers = num_layers
        self.sigmoid_output = sigmoid_output
        h = [hidden_dim] * (num_layers - 1)
        dims = list(zip([input_dim] + h, h + [output_dim]))
        if key is None:
            key = jax.random.PRNGKey(0)
        # Weights are stored PRE-TRANSPOSED as (in_features, out_features) so
        # the kernel feeds the MXU in its native orientation (y = x @ w).
        self.weights_t = []
        self.biases = []
        for (n_in, n_out) in dims:
            key, wk, bk = jax.random.split(key, 3)
            bound = 1.0 / float(n_in) ** 0.5   # mimics PyTorch U(-1/sqrt(fan_in), .)
            w_t = jax.random.uniform(wk, (n_in, n_out), jnp.float32, -bound, bound)
            b = jax.random.uniform(bk, (n_out,), jnp.float32, -bound, bound)
            self.weights_t.append(w_t)
            self.biases.append(b)

    def __call__(self, x):
        # x: [..., input_dim]; flatten leading axes for the 2D fused kernel.
        lead_shape = x.shape[:-1]
        x2d = x.reshape(-1, x.shape[-1])
        y2d = mlp_forward_pallas(
            x2d, self.weights_t, self.biases, self.sigmoid_output
        )
        return y2d.reshape(*lead_shape, y2d.shape[-1])


if __name__ == "__main__":
    key = jax.random.PRNGKey(0)
    key, xk, pk = jax.random.split(key, 3)

    # Small shapes consistent with the module: tokens of dim 32 -> hidden 32 -> out 16.
    B, T, D_IN, D_HID, D_OUT, N_LAYERS = 2, 8, 32, 32, 16, 3
    x = jax.random.normal(xk, (B, T, D_IN), jnp.float32)

    mlp = MLPPallas(D_IN, D_HID, D_OUT, N_LAYERS, sigmoid_output=True, key=pk)
    out = mlp(x)
    out = jax.block_until_ready(out)

    # Pure-JAX reference check of the same forward pass.
    ref = x.reshape(-1, D_IN)
    for i, (w_t, b) in enumerate(zip(mlp.weights_t, mlp.biases)):
        ref = ref @ w_t + b
        if i < N_LAYERS - 1:
            ref = jnp.maximum(ref, 0.0)
    ref = jax.nn.sigmoid(ref).reshape(B, T, D_OUT)
    assert out.shape == (B, T, D_OUT)
    assert jnp.allclose(out, ref, atol=1e-5, rtol=1e-5)

    print("KERNEL_OK")
</pallas_src>

<mosaic_0001>
module attributes {stable_mosaic.version = 11 : i64} {
  func.func @_mlp_fused_kernel(%arg0: memref<16x32xf32, #tpu.memory_space<vmem>>, %arg1: memref<32x32xf32, #tpu.memory_space<vmem>>, %arg2: memref<1x32xf32, #tpu.memory_space<vmem>>, %arg3: memref<32x32xf32, #tpu.memory_space<vmem>>, %arg4: memref<1x32xf32, #tpu.memory_space<vmem>>, %arg5: memref<32x16xf32, #tpu.memory_space<vmem>>, %arg6: memref<1x16xf32, #tpu.memory_space<vmem>>, %arg7: memref<16x16xf32, #tpu.memory_space<vmem>>) attributes {dimension_semantics = [], scalar_prefetch = 0 : i64, scratch_operands = 0 : i64, tpu.core_type = #tpu.core_type<tc>} {
    %c0 = arith.constant 0 : index
    %c0_0 = arith.constant 0 : index
    %0 = vector.load %arg0[%c0, %c0_0] : memref<16x32xf32, #tpu.memory_space<vmem>>, vector<16x32xf32>
    %c0_1 = arith.constant 0 : index
    %c0_2 = arith.constant 0 : index
    %1 = vector.load %arg1[%c0_1, %c0_2] : memref<32x32xf32, #tpu.memory_space<vmem>>, vector<32x32xf32>
    %c0_3 = arith.constant 0 : index
    %c0_4 = arith.constant 0 : index
    %2 = vector.load %arg2[%c0_3, %c0_4] : memref<1x32xf32, #tpu.memory_space<vmem>>, vector<1x32xf32>
    %cst = arith.constant dense<0.000000e+00> : vector<16x32xf32>
    %3 = tpu.matmul %0, %1, %cst {dimension_numbers = #tpu.dot_dimension_numbers<[1], [0], [0], [1], [0, 0, 1, 1], [], []>} : vector<16x32xf32>, vector<32x32xf32>, vector<16x32xf32> -> vector<16x32xf32>
    %4 = vector.broadcast %2 : vector<1x32xf32> to vector<16x32xf32>
    %5 = arith.addf %3, %4 : vector<16x32xf32>
    %cst_5 = arith.constant 0.000000e+00 : f32
    %6 = vector.broadcast %cst_5 : f32 to vector<16x32xf32>
    %7 = arith.maximumf %5, %6 : vector<16x32xf32>
    %c0_6 = arith.constant 0 : index
    %c0_7 = arith.constant 0 : index
    %8 = vector.load %arg3[%c0_6, %c0_7] : memref<32x32xf32, #tpu.memory_space<vmem>>, vector<32x32xf32>
    %c0_8 = arith.constant 0 : index
    %c0_9 = arith.constant 0 : index
    %9 = vector.load %arg4[%c0_8, %c0_9] : memref<1x32xf32, #tpu.memory_space<vmem>>, vector<1x32xf32>
    %cst_10 = arith.constant dense<0.000000e+00> : vector<16x32xf32>
    %10 = tpu.matmul %7, %8, %cst_10 {dimension_numbers = #tpu.dot_dimension_numbers<[1], [0], [0], [1], [0, 0, 1, 1], [], []>} : vector<16x32xf32>, vector<32x32xf32>, vector<16x32xf32> -> vector<16x32xf32>
    %11 = vector.broadcast %9 : vector<1x32xf32> to vector<16x32xf32>
    %12 = arith.addf %10, %11 : vector<16x32xf32>
    %cst_11 = arith.constant 0.000000e+00 : f32
    %13 = vector.broadcast %cst_11 : f32 to vector<16x32xf32>
    %14 = arith.maximumf %12, %13 : vector<16x32xf32>
    %c0_12 = arith.constant 0 : index
    %c0_13 = arith.constant 0 : index
    %15 = vector.load %arg5[%c0_12, %c0_13] : memref<32x16xf32, #tpu.memory_space<vmem>>, vector<32x16xf32>
    %c0_14 = arith.constant 0 : index
    %c0_15 = arith.constant 0 : index
    %16 = vector.load %arg6[%c0_14, %c0_15] : memref<1x16xf32, #tpu.memory_space<vmem>>, vector<1x16xf32>
    %cst_16 = arith.constant dense<0.000000e+00> : vector<16x16xf32>
    %17 = tpu.matmul %14, %15, %cst_16 {dimension_numbers = #tpu.dot_dimension_numbers<[1], [0], [0], [1], [0, 0, 1, 1], [], []>} : vector<16x32xf32>, vector<32x16xf32>, vector<16x16xf32> -> vector<16x16xf32>
    %18 = vector.broadcast %16 : vector<1x16xf32> to vector<16x16xf32>
    %19 = arith.addf %17, %18 : vector<16x16xf32>
    %cst_17 = arith.constant 0.000000e+00 : f32
    %20 = vector.broadcast %cst_17 : f32 to vector<16x16xf32>
    %21 = arith.subf %20, %19 : vector<16x16xf32>
    %22 = math.exp %21 : vector<16x16xf32>
    %cst_18 = arith.constant 1.000000e+00 : f32
    %23 = vector.broadcast %cst_18 : f32 to vector<16x16xf32>
    %24 = arith.addf %23, %22 : vector<16x16xf32>
    %25 = tpu.reciprocal %24 : vector<16x16xf32> -> vector<16x16xf32>
    %c0_19 = arith.constant 0 : index
    %c0_20 = arith.constant 0 : index
    %26 = vector.load %arg7[%c0_19, %c0_20] : memref<16x16xf32, #tpu.memory_space<vmem>>, vector<16x16xf32>
    tpu.vector_store %arg7[%c0_19, %c0_20], %25 {strides = array<i32>} : memref<16x16xf32, #tpu.memory_space<vmem>>, vector<16x16xf32>,
    return
  }
}

</mosaic_0001>

<bundles_post_ra>
// kernel: tpu_custom_call.1
= control target key start
LH: loop header
LB: loop body
LE: loop exit
PB: predicated region body
PF: predicated region fallthrough
CT: control target
= control target key end

     0   :  { %12 = vsyncpa [#allocation3], 0  ;;  %s571_s0 = inlined_call_operand.vmem [shape: f32[16,32], index: 0, kind: input, shape index: {}]   ;;  %s572_s1 = inlined_call_operand.vmem [shape: f32[32,32], index: 1, kind: input, shape index: {}]   ;;  %s573_s2 = inlined_call_operand.vmem [shape: f32[1,32], index: 2, kind: input, shape index: {}]   ;;  %s574_s3 = inlined_call_operand.hbm [shape: f32[32,32], index: 3, kind: input, shape index: {}]   ;;  %s575_s4 = inlined_call_operand.vmem [shape: f32[1,32], index: 4, kind: input, shape index: {}]   ;;  %s576_s5 = inlined_call_operand.vmem [shape: f32[32,16], index: 5, kind: input, shape index: {}]   ;;  %s577_s6 = inlined_call_operand.vmem [shape: f32[1,16], index: 6, kind: input, shape index: {}]   ;;  %s578_s7 = inlined_call_operand.hbm [shape: f32[16,16], index: 7, kind: output, shape index: {}]  }
   0x1   :  { %13 = vsyncpa [#allocation4], 0  ;;  %s470_s24 = smov [#allocation2]  }
   0x2   :  { %s25_s25 = sshll.u32 %s470_s24, 4  ;;  %s26_s25 = int_to_ptr.vmem [resolvable:$true] %s25_s25 }
   0x3   :  { %s434_s26 = scalar_lea.vmem %s26_s25, 512  ;;  %p439_p1 = scmp.lt.s32.totalorder %s26_s25, %s26_s25 }
   0x4   :  { %p435_p0 = scmp.ne.s32.totalorder %s26_s25, %s434_s26  ;;  %p440_p2 = scmp.lt.s32.totalorder %s434_s26, %s434_s26 }
   0x6   :  { %p441_p3 = por %p440_p2, %p439_p1 }
   0x8   :  { %p442_p4 = pnand %p441_p3, %p435_p0 }
   0xa   :  { %445 = shalt.err (!%p442_p4)
}
   0xb   :  { %s471_s27 = smov 128   ;;  %s472_s28 = smov 8  }
   0xc   :  { %31 = dma.hbm_to_vmem [thread:$0]  %s574_s3, 512, %s26_s25, [#allocation3], %s471_s27, %s471_s27, %s472_s28  }
   0xd   :  { %466 = dma.done.wait [#allocation3], 512  }
   0xe   :  { %467 = vsyncadd [#allocation3], 4294966784  ;;  %vm54_vm0 = vcmask 261120   ;;  %v46_v0 = vld [vmem:[%s572_s1 + $0x18] sm:$0xff]  ;;  %v45_v1 = vld [vmem:[%s572_s1 + $0x10] sm:$0xff]  ;;  %vm334_vm1 = vcmask 130048  }
   0xf   :  { %381 = vmatprep.subr.mxu0 %v46_v0  ;;  %v41_v2 = vld [vmem:[%s571_s0] sm:$0xff]  ;;  %v44_v3 = vld [vmem:[%s572_s1 + $0x8] sm:$0xff]  ;;  %v141_v6 = vld [vmem:[#allocation2 + $0x18] sm:$0xff] }
  0x10   :  { %382 = vmatpush3.msra.mxu0 %v46_v0  ;;  %389 = vmatprep.mubr.msk.f32.mxu0 %vm54_vm0, %v41_v2  ;;  %v43_v4 = vld [vmem:[%s572_s1] sm:$0xff]  ;;  %v42_v5 = vld [vmem:[%s571_s0 + $0x8] sm:$0xff]  ;;  %v140_v7 = vld [vmem:[#allocation2 + $0x10] sm:$0xff] }
  0x11   :  { %383 = vmatprep.subr.mxu0 %v45_v1  ;;  %392 = vmatprep.subr.mxu1 %v141_v6  ;;  %v139_v8 = vld [vmem:[#allocation2 + $0x8] sm:$0xff]  ;;  %v138_v9 = vld [vmem:[#allocation2] sm:$0xff]  ;;  %v235_v17 = vld [vmem:[%s576_s5 + $0x18] sm:$0xff] }
  0x12   :  { %384 = vmatpush3.msra.mxu0 %v45_v1  ;;  %393 = vmatpush3.msra.mxu1 %v141_v6  ;;  %v354_v10 = vld [vmem:[%s573_s2] ss:$0 sm:$0xff]  ;;  %v234_v18 = vld [vmem:[%s576_s5 + $0x10] sm:$0xff]  ;;  %v233_v19 = vld [vmem:[%s576_s5 + $0x8] sm:$0xff] }
  0x13   :  { %385 = vmatprep.subr.mxu0 %v44_v3  ;;  %394 = vmatprep.subr.mxu1 %v140_v7  ;;  %v232_v20 = vld [vmem:[%s576_s5] sm:$0xff] }
  0x14   :  { %386 = vmatpush3.msra.mxu0 %v44_v3  ;;  %395 = vmatpush3.msra.mxu1 %v140_v7  ;;  %v357_v21 = vld [vmem:[%s575_s4] ss:$0 sm:$0xff]  ;;  %s473_s4 = smov [#allocation5]  }
  0x15   :  { %387 = vmatprep.subr.mxu0 %v43_v4  ;;  %396 = vmatprep.subr.mxu1 %v139_v8  ;;  %v360_v28 = vld [vmem:[%s577_s6] ss:$0 sm:$0xff]  ;;  %s342_s5 = sshll.u32 %s473_s4, 4  ;;  %s343_s5 = int_to_ptr.vmem [resolvable:$true] %s342_s5 }
  0x16   :  { %388 = vmatpush3.msra.mxu0 %v43_v4  ;;  %397 = vmatpush3.msra.mxu1 %v139_v8  ;;  %s446_s6 = scalar_lea.vmem %s343_s5, 256  ;;  %p451_p6 = scmp.lt.s32.totalorder %s343_s5, %s343_s5 }
  0x17   :  { %390 = vmatmul.mubr.msk.f32.vlgmr.msra.gmra.mxu0 %vm54_vm0, %v42_v5  ;;  %398 = vmatprep.subr.mxu1 %v138_v9  ;;  %p447_p5 = scmp.ne.s32.totalorder %s343_s5, %s446_s6  ;;  %p452_p7 = scmp.lt.s32.totalorder %s446_s6, %s446_s6 }
  0x18   :  { %399 = vmatpush3.msra.mxu1 %v138_v9  ;;  %403 = vmatprep.subr.mxu0 %v235_v17 }
  0x19   :  { %404 = vmatpush3.msra.mxu0 %v235_v17  ;;  %p453_p8 = por %p452_p7, %p451_p6 }
  0x1a   :  { %405 = vmatprep.subr.mxu0 %v234_v18 }
  0x1b   :  { %406 = vmatpush3.msra.mxu0 %v234_v18  ;;  %p454_p9 = pnand %p453_p8, %p447_p5 }
  0x1c   :  { %407 = vmatprep.subr.mxu0 %v233_v19 }
  0x1d   :  { %408 = vmatpush3.msra.mxu0 %v233_v19 }
  0x1e   :  { %409 = vmatprep.subr.mxu0 %v232_v20 }
  0x1f   :  { %410 = vmatpush3.msra.mxu0 %v232_v20 }
  0xd7   :  { %v391_v11 = vpop.f32.mrf.mxu0 }
  0xd8   :  { %v133_v12 = vadd.f32 %v391_v11, %v354_v10 }
  0xd9   :  { %v127_v13 = vpop.f32.mrf.mxu0 }
  0xda   :  { %v128_v14 = vadd.f32 %v354_v10, %v127_v13  ;;  %v137_v16 = vmax.f32 %v133_v12, 0.0 }
  0xdc   :  { %v136_v15 = vmax.f32 %v128_v14, 0.0 }
  0xde   :  { %400 = vmatprep.mubr.msk.f32.mxu1 %vm54_vm0, %v136_v15 }
  0xdf   :  { %401 = vmatmul.mubr.msk.f32.vlgmr.msra.gmra.mxu1 %vm54_vm0, %v137_v16 }
 0x19f   :  { %v402_v22 = vpop.f32.mrf.mxu1 }
 0x1a0   :  { %v227_v23 = vadd.f32 %v402_v22, %v357_v21 }
 0x1a1   :  { %v221_v24 = vpop.f32.mrf.mxu1 }
 0x1a2   :  { %v222_v25 = vadd.f32 %v357_v21, %v221_v24  ;;  %v231_v27 = vmax.f32 %v227_v23, 0.0 }
 0x1a4   :  { %v230_v26 = vmax.f32 %v222_v25, 0.0 }
 0x1a6   :  { %411 = vmatprep.mubr.msk.f32.mxu0 %vm54_vm0, %v230_v26 }
 0x1a7   :  { %412 = vmatmul.mubr.msk.f32.vlgmr.msra.gmra.mxu0 %vm54_vm0, %v231_v27 }
 0x267   :  { %v413_v29 = vpop.f32.mrf.mxu0 }
 0x268   :  { %v321_v30 = vadd.f32 %v413_v29, %v360_v28 }
 0x269   :  { %v315_v31 = vpop.f32.mrf.mxu0 }
 0x26a   :  { %v325_v32 = vsub.f32 0.0, %v321_v30  ;;  %v316_v33 = vadd.f32 %v360_v28, %v315_v31 }
 0x26c   :  { %v328_v34 = vmul.f32 1.442695, %v325_v32  ;;  %v324_v35 = vsub.f32 0.0, %v316_v33 }
 0x26e   :  { %418 = vpow2.f32 %v328_v34  ;;  %v326_v36 = vmul.f32 1.442695, %v324_v35 }
 0x270   :  { %420 = vpow2.f32 %v326_v36 }
 0x27b   :  { %v419_v37 = vpop.eup %418 }
 0x27c   :  { %v331_v38 = vadd.f32 1.0, %v419_v37 }
 0x27d   :  { %v421_v39 = vpop.eup %420 }
 0x27e   :  { %422 = vrcp.f32 %v331_v38  ;;  %v330_v40 = vadd.f32 1.0, %v421_v39 }
 0x280   :  { %424 = vrcp.f32 %v330_v40 }
 0x28b   :  { %v423_v41 = vpop.eup %422 }
 0x28c   :  { %336 = vst.msk [vmem:[#allocation5 + $0x8] sm:$0xff] %vm334_vm1, %v423_v41 }
 0x28d   :  { %v425_v42 = vpop.eup %424 }
 0x28e   :  { %335 = vst.msk [vmem:[#allocation5] sm:$0xff] %vm334_vm1, %v425_v42 }
 0x28f   :  { %457 = shalt.err (!%p454_p9)
}
 0x290   :  { %348 = dma.vmem_to_hbm [thread:$0]  %s343_s5, 256, %s578_s7, [#allocation4], %s471_s27, %s471_s27, %s472_s28  }
 0x291   :  { %468 = dma.done.wait [#allocation4], 256  }
 0x292   :  { %469 = vsyncadd [#allocation4], 4294967040 }
 0x293   :  { %352 = vsyncpa [#allocation3], 1 }
 0x294   :  { %353 = vsyncpa [#allocation4], 1 }

</bundles_post_ra>
